<compile_context>
chip_gen: v6e
topology: v6e:2x2x1
jax: 0.10.0
libtpu: 0.0.40
codegen_flags: <defaults>
</compile_context>

<pallas_src>
import functools
import math

import jax
import jax.numpy as jnp
from jax.experimental import pallas as pl
from jax.experimental.pallas import tpu as pltpu

_MIB = 1024 * 1024


def _gwl_kernel(x_ref, w_ref, b_ref, o_ref, *, apply_sigmoid):
    # x_ref: (TB, C, H)   w_ref: (1, C, H)   b_ref: (1, C)   o_ref: (TB, C)
    prod = x_ref[...] * w_ref[...]                    # broadcast over TB, storage dtype
    s = jnp.sum(prod, axis=-1, dtype=jnp.float32)     # (TB, C) f32-accumulated lane reduce
    s = s + b_ref[...].astype(jnp.float32)
    if apply_sigmoid:
        s = jax.nn.sigmoid(s)                         # EUP epilogue; free in a mem-bound kernel
    o_ref[...] = s.astype(o_ref.dtype)


def _tpu_generation_and_vmem():
    """Best-effort chip-generation + physical VMEM detection (safe fallbacks)."""
    kind = ""
    try:
        kind = jax.devices()[0].device_kind.lower()
    except Exception:
        kind = ""
    vmem_cap = None
    try:
        vmem_cap = int(pltpu.get_tpu_info().vmem_capacity_bytes)
    except Exception:
        vmem_cap = None

    if "v5" in kind:
        gen = 5
    elif "v6" in kind:
        gen = 6
    elif "v7" in kind or "7x" in kind:
        gen = 7
    elif vmem_cap is not None and vmem_cap <= 64 * _MIB:
        gen = 7      # small per-core VMEM => assume v7x-class
    else:
        gen = 6      # default to v6e-class behaviour

    if vmem_cap is None:
        vmem_cap = 64 * _MIB if gen == 7 else 128 * _MIB
    return gen, vmem_cap


def _gen_budgets(gen, vmem_cap):
    # (x tile target bytes, total explicit-footprint budget)
    if gen == 5:
        x_tile_target, vmem_budget = 4 * _MIB, 48 * _MIB
    elif gen == 7:
        x_tile_target, vmem_budget = 10 * _MIB, 44 * _MIB
    else:  # v6e-class
        x_tile_target, vmem_budget = 14 * _MIB, 64 * _MIB
    vmem_budget = min(vmem_budget, (vmem_cap * 3) // 4)
    return x_tile_target, vmem_budget


def _per_elem_bytes(itemsize, gen):
    # 2x storage (double-buffered x DMA) + 4B f32 product intermediate
    # (+4B x-upcast copy on v5e, which has no sub-f32 VALU path).
    per_elem = 2 * itemsize + 4
    if gen == 5 and itemsize < 4:
        per_elem += 4
    return per_elem


def _fixed_bytes(C, H, itemsize):
    # Resident W (double-buffered) + possible f32 upcast of W + bias + slack.
    return 2 * C * H * itemsize + C * H * 4 + 4 * C * 4 + 2 * _MIB


def _auto_tb(B, C, H, itemsize, gen, vmem_cap):
    x_tile_target, vmem_budget = _gen_budgets(gen, vmem_cap)
    per_elem = _per_elem_bytes(itemsize, gen)
    fixed = _fixed_bytes(C, H, itemsize)

    row_bytes_budget = max(1, C * H * per_elem)
    row_bytes_tile = max(1, C * H * itemsize)
    tb_budget = max(8, (vmem_budget - fixed) // row_bytes_budget)
    tb_target = max(8, x_tile_target // row_bytes_tile)
    tb = int(min(tb_budget, tb_target, B))

    # Keep the grid from collapsing: >=4 steps on v7x (2 per TensorCore with the
    # "parallel" batch axis), >=2 steps elsewhere so double-buffering overlaps.
    min_steps = 4 if gen == 7 else 2
    if B >= min_steps * 8:
        cap = max(8, (((B + min_steps - 1) // min_steps) // 8) * 8)
        tb = min(tb, cap)
    return max(1, tb)


def _vmem_limit(tb, C, H, itemsize, gen, vmem_cap):
    footprint = (2 * tb * C * H * itemsize          # double-buffered x tiles
                 + tb * C * H * 4                   # f32 product intermediate
                 + (tb * C * H * 4 if (gen == 5 and itemsize < 4) else 0)
                 + 2 * tb * C * 4                   # double-buffered output blocks
                 + _fixed_bytes(C, H, itemsize))
    return int(min(max(footprint + 8 * _MIB, 32 * _MIB), vmem_cap))


def group_wise_linear(x, W, b, *, tb=None, apply_sigmoid=False):
    """x: (B, C, H), W: (1, C, H), b: (1, C)  ->  (B, C)  [optionally sigmoid-ed]."""
    B, C, H = x.shape
    assert W.shape == (1, C, H)
    assert b.shape == (1, C)
    itemsize = jnp.dtype(x.dtype).itemsize

    gen, vmem_cap = _tpu_generation_and_vmem()
    if tb is None:
        tb = _auto_tb(B, C, H, itemsize, gen, vmem_cap)

    # Normalize the batch-chunk size.
    tb = int(min(max(int(tb), 1), B))
    if tb < B:
        tb = max(8, (tb // 8) * 8)                   # sublane-friendly sub-block
        if B % tb != 0:
            # Prefer a tb that divides B (avoids a padded remainder step).
            for cand in range(tb, max(7, tb // 2), -8):
                if B % cand == 0:
                    tb = cand
                    break

    vmem_limit = _vmem_limit(tb, C, H, itemsize, gen, vmem_cap)
    grid = (pl.cdiv(B, tb),)
    kernel = functools.partial(_gwl_kernel, apply_sigmoid=apply_sigmoid)

    return pl.pallas_call(
        kernel,
        out_shape=jax.ShapeDtypeStruct((B, C), x.dtype),
        grid_spec=pltpu.PrefetchScalarGridSpec(
            num_scalar_prefetch=0,
            grid=grid,
            in_specs=[
                pl.BlockSpec((tb, C, H), lambda i: (i, 0, 0)),   # x: TB batch rows per step
                pl.BlockSpec((1, C, H), lambda i: (0, 0, 0)),    # W: shared, stays resident
                pl.BlockSpec((1, C), lambda i: (0, 0)),          # b: shared, stays resident
            ],
            out_specs=pl.BlockSpec((tb, C), lambda i: (i, 0)),   # one (TB, C) slab per step
        ),
        compiler_params=pltpu.CompilerParams(
            dimension_semantics=("parallel",),        # megacore split of the batch axis (v7x)
            vmem_limit_bytes=vmem_limit,              # generation-aware, footprint-accounted
        ),
    )(x, W, b)


def init_params(key, num_class, hidden_dim, dtype=jnp.float32):
    """Deterministic init mirroring reset_parameters: uniform(-stdv, stdv)."""
    stdv = 1.0 / math.sqrt(hidden_dim)
    kw, kb = jax.random.split(key)
    W = jax.random.uniform(kw, (1, num_class, hidden_dim), dtype=dtype,
                           minval=-stdv, maxval=stdv)
    b = jax.random.uniform(kb, (1, num_class), dtype=dtype,
                           minval=-stdv, maxval=stdv)
    return W, b


if __name__ == "__main__":
    # Small demo shapes consistent with the module's class head (num_class x hidden_dim).
    B, num_class, hidden_dim = 32, 8, 128

    key = jax.random.PRNGKey(0)
    kx, kp = jax.random.split(key)
    x = jax.random.normal(kx, (B, num_class, hidden_dim), dtype=jnp.float32)
    W, b = init_params(kp, num_class, hidden_dim)

    # Auto-tiled path (generation-aware tb / vmem_limit selection).
    out_auto = jax.block_until_ready(group_wise_linear(x, W, b))
    # Forced tb=8 path exercises the multi-step pipelined batch grid.
    out_tiled = jax.block_until_ready(group_wise_linear(x, W, b, tb=8))
    # Fused sigmoid epilogue (RefinementAppNet applies self.sigmoid to this head).
    out_sig = jax.block_until_ready(group_wise_linear(x, W, b, tb=8, apply_sigmoid=True))

    # Reference check (plain JAX) — same semantics as the PyTorch forward.
    # Tolerance note: the multiply runs in the storage dtype before the f32 reduce.
    ref = jnp.sum(W * x, axis=-1) + b
    assert out_auto.shape == (B, num_class)
    assert jnp.allclose(out_auto, ref, atol=1e-5, rtol=1e-5), "mismatch vs reference (auto)"
    assert jnp.allclose(out_tiled, ref, atol=1e-5, rtol=1e-5), "mismatch vs reference (tiled)"
    assert jnp.allclose(out_sig, jax.nn.sigmoid(ref), atol=1e-5, rtol=1e-5), "mismatch (sigmoid)"

    print("KERNEL_OK")
</pallas_src>

<mosaic_0001>
module attributes {stable_mosaic.version = 11 : i64} {
  func.func @_gwl_kernel(%arg0: i32, %arg1: memref<16x8x128xf32, #tpu.memory_space<vmem>>, %arg2: memref<1x8x128xf32, #tpu.memory_space<vmem>>, %arg3: memref<1x8xf32, #tpu.memory_space<vmem>>, %arg4: memref<16x8xf32, #tpu.memory_space<vmem>>) attributes {dimension_semantics = [#tpu.dimension_semantics<parallel>], iteration_bounds = array<i64: 2>, scalar_prefetch = 0 : i64, scratch_operands = 0 : i64, tpu.core_type = #tpu.core_type<tc>, window_params = [{transform_indices = @transform_0, window_bounds = array<i64: 16, 8, 128>}, {pipeline_mode = #tpu.pipeline_mode<synchronous>, transform_indices = @transform_1, window_bounds = array<i64: 1, 8, 128>}, {pipeline_mode = #tpu.pipeline_mode<synchronous>, transform_indices = @transform_2, window_bounds = array<i64: 1, 8>}, {transform_indices = @transform_3, window_bounds = array<i64: 16, 8>}]} {
    %c0 = arith.constant 0 : index
    %c0_0 = arith.constant 0 : index
    %c0_1 = arith.constant 0 : index
    %0 = vector.load %arg1[%c0, %c0_0, %c0_1] : memref<16x8x128xf32, #tpu.memory_space<vmem>>, vector<16x8x128xf32>
    %c0_2 = arith.constant 0 : index
    %c0_3 = arith.constant 0 : index
    %c0_4 = arith.constant 0 : index
    %1 = vector.load %arg2[%c0_2, %c0_3, %c0_4] : memref<1x8x128xf32, #tpu.memory_space<vmem>>, vector<1x8x128xf32>
    %2 = vector.broadcast %1 : vector<1x8x128xf32> to vector<16x8x128xf32>
    %3 = arith.mulf %0, %2 : vector<16x8x128xf32>
    %cst = arith.constant dense<0.000000e+00> : vector<16x8xf32>
    %4 = vector.multi_reduction <add>, %3, %cst [2] : vector<16x8x128xf32> to vector<16x8xf32>
    %c0_5 = arith.constant 0 : index
    %c0_6 = arith.constant 0 : index
    %5 = vector.load %arg3[%c0_5, %c0_6] : memref<1x8xf32, #tpu.memory_space<vmem>>, vector<1x8xf32>
    %6 = vector.broadcast %5 : vector<1x8xf32> to vector<16x8xf32>
    %7 = arith.addf %4, %6 : vector<16x8xf32>
    %c0_7 = arith.constant 0 : index
    %c0_8 = arith.constant 0 : index
    %8 = vector.load %arg4[%c0_7, %c0_8] : memref<16x8xf32, #tpu.memory_space<vmem>>, vector<16x8xf32>
    tpu.vector_store %arg4[%c0_7, %c0_8], %7 {strides = array<i32>} : memref<16x8xf32, #tpu.memory_space<vmem>>, vector<16x8xf32>,
    return
  }
  func.func @transform_0(%arg0: i32) -> (i32, i32, i32) {
    %c0_i32 = arith.constant 0 : i32
    %c0_i32_0 = arith.constant 0 : i32
    %c0_i32_1 = arith.constant 0 : i32
    return %arg0, %c0_i32, %c0_i32_0 : i32, i32, i32
  }
  func.func @transform_1(%arg0: i32) -> (i32, i32, i32) {
    %c0_i32 = arith.constant 0 : i32
    %c0_i32_0 = arith.constant 0 : i32
    %c0_i32_1 = arith.constant 0 : i32
    %c0_i32_2 = arith.constant 0 : i32
    return %c0_i32, %c0_i32_0, %c0_i32_1 : i32, i32, i32
  }
  func.func @transform_2(%arg0: i32) -> (i32, i32) {
    %c0_i32 = arith.constant 0 : i32
    %c0_i32_0 = arith.constant 0 : i32
    %c0_i32_1 = arith.constant 0 : i32
    return %c0_i32, %c0_i32_0 : i32, i32
  }
  func.func @transform_3(%arg0: i32) -> (i32, i32) {
    %c0_i32 = arith.constant 0 : i32
    %c0_i32_0 = arith.constant 0 : i32
    return %arg0, %c0_i32 : i32, i32
  }
}

</mosaic_0001>

<bundles_post_ra>
// kernel: tpu_custom_call.1
= control target key start
LH: loop header
LB: loop body
LE: loop exit
PB: predicated region body
PF: predicated region fallthrough
CT: control target
= control target key end

     0   :  { %8 = vsyncpa [#allocation3], 0  ;;  %s875_s0 = inlined_call_operand.hbm [shape: f32[32,8,128], index: 0, kind: input, shape index: {}]   ;;  %s876_s1 = inlined_call_operand.hbm [shape: f32[1,8,128], index: 1, kind: input, shape index: {}]   ;;  %s877_s2 = inlined_call_operand.vmem [shape: f32[1,8], index: 2, kind: input, shape index: {}]   ;;  %s878_s3 = inlined_call_operand.vmem [shape: f32[32,8], index: 3, kind: output, shape index: {}]  }
   0x1   :  { %10 = vsyncpa [#allocation3 + $0x1], 0 }
   0x2   :  { %11 = vsyncpa [#allocation5], 0  ;;  %s721_s12 = smov 0   ;;  %s723_s13 = smov 0  }
   0x3   :  { %s725_s14 = smov 0   ;;  %s727_s15 = smov 0  }
   0x4 LB: > { %s530_s16 = sadd.s32 4294967295, %s694_s15   ;;  %s741_s17 = sadd.s32 1, %s694_s15   ;;  %s694_s15 = sphi %s727_s15, %s894_s15   ;;  %s690_s14 = sphi %s725_s14, %s893_s14   ;;  %s686_s13 = sphi %s723_s13, %s892_s13   ;;  %s682_s12 = sphi %s721_s12, %s891_s12  }
   0x5   : > { %s21_s18 = ssub.s32 %s694_s15, %s741_s17  ;;  %s24_s19 = sadd.s32 1, %s690_s14 }
   0x6   : > { %p22_p0 = scmp.eq.s32.totalorder %s21_s18, 0  ;;  %p31_p1 = scmp.ne.s32.totalorder %s690_s14, %s686_s13 }
   0x7   : > { %p32_p2 = scmp.eq.s32.totalorder %s694_s15, 0  ;;  %p37_p3 = scmp.ne.s32.totalorder %s686_s13, %s682_s12 }
   0x8   : > { %s751_s20 = scalar_select %p22_p0, %s690_s14, %s24_s19  }
   0x9   : > { %p753_p4 = por %p32_p2, %p31_p1  ;;  %p759_p5 = scmp.eq.s32.totalorder %s530_s16, 0 }
   0xa   : > { %p532_p6 = scmp.ge.s32.totalorder %s694_s15, 1  ;;  %p116_p7 = scmp.lt.s32.totalorder %s694_s15, 3 }
   0xb   : > { %s884_s22 = scalar_select %p759_p5, 1, 0 }
   0xc   : > { %p767_p8 = por %p759_p5, %p37_p3  ;;  %p771_p9 = pnand %p532_p6, %p116_p7 }
   0xd   : > { %s696_s25 = smov [#allocation4]   ;;  %p562_p11 = scmp.lt.s32.totalorder %s694_s15, 2 }
   0xe   : > { %s885_s23 = scalar_select %p767_p8, 1, 0 }
   0xf   : > { %s886_s24 = scalar_select %p771_p9, 1, 0 }
  0x10   : > { %s129_s26 = sshll.u32 %s696_s25, 4  ;;  %p553_p10 = pneg %p771_p9  ;;  %s130_s26 = int_to_ptr.vmem [resolvable:$true] %s129_s26 }
  0x11   : > { %s143_s27 = sand.u32 1, %s690_s14   ;;  %p783_p13 = pnand %p562_p11, %p753_p4 }
  0x12   : > { %p554_p12 = pnand %p553_p10, %p759_p5  ;;  %s535_s29 = sshll.u32 %s143_s27, 7 }
  0x13   : > { %s613_s30 = scalar_lea.vmem %s130_s26, 128  ;;  %p621_p6 = scmp.lt.s32.totalorder %s130_s26, %s130_s26 }
  0x14   : > { %p604_p0 = pneg %p554_p12  ;;  %p614_p1 = scmp.ne.s32.totalorder %s130_s26, %s613_s30 }
  0x15   : > { %p622_p7 = scmp.lt.s32.totalorder %s613_s30, %s613_s30 }
  0x16   : > { %p616_p2 = pnand %p614_p1, %p604_p0 }
  0x17   : > { %p623_p8 = por %p622_p7, %p621_p6 }
  0x18   : > { %p617_p3 = pneg %p616_p2 }
  0x1a   : > { %p624_p9 = pnand %p623_p8, %p617_p3 }
  0x1c   : > { %627 = shalt.err (!%p624_p9)
}
  0x1d   : > { %556 = dma.hbm_to_vmem [thread:$0]  (!%p554_p12), %s876_s1, 128, %s130_s26, [#allocation5]  }
  0x1e   : > { %s546_s6 = sshll.u32 %s694_s15, 11  ;;  %s147_s10 = scalar_lea.vmem [#allocation2], %s535_s29 }
  0x1f   : > { %s794_s9 = scalar_lea.hbm %s875_s0, %s546_s6  ;;  %s154_s11 = sshll.u32 %s147_s10, 4  ;;  %s796_s11 = int_to_ptr.vmem [resolvable:$true] %s154_s11 }
  0x20   : > { %s798_s12 = scalar_lea.sflag [#allocation3], %s143_s27  ;;  %s628_s18 = scalar_lea.hbm %s794_s9, 2048 }
  0x21   : > { %p629_p4 = scmp.ne.s32.totalorder %s794_s9, %s628_s18  ;;  %p630_p8 = pneg %p783_p13 }
  0x22   : > { %s633_s25 = scalar_lea.hbm %s875_s0, 4096  ;;  %p634_p11 = scmp.lt.s32.totalorder %s794_s9, %s875_s0 }
  0x23   : > { %p631_p9 = pnand %p630_p8, %p629_p4  ;;  %p635_p12 = scmp.lt.s32.totalorder %s633_s25, %s628_s18 }
  0x25   : > { %p632_p10 = pneg %p631_p9  ;;  %p636_p0 = por %p635_p12, %p634_p11 }
  0x27   : > { %p637_p1 = pnand %p636_p0, %p632_p10 }
  0x29   : > { %640 = shalt.err (!%p637_p1)
}
  0x2a   : > { %s641_s27 = scalar_lea.vmem %s796_s11, 2048  ;;  %s697_s29 = smov [#allocation2]  }
  0x2b   : > { %p642_p2 = scmp.ne.s32.totalorder %s796_s11, %s641_s27  ;;  %s646_s4 = sshll.u32 %s697_s29, 4  ;;  %s647_s4 = int_to_ptr.vmem [resolvable:$false] %s646_s4 }
  0x2c   : > { %s648_s5 = scalar_lea.vmem %s647_s4, 4096  ;;  %p649_p7 = scmp.lt.s32.totalorder %s796_s11, %s647_s4 }
  0x2d   : > { %p644_p3 = pnand %p642_p2, %p630_p8  ;;  %p650_p4 = scmp.lt.s32.totalorder %s648_s5, %s641_s27 }
  0x2f   : > { %p645_p6 = pneg %p644_p3  ;;  %p651_p9 = por %p650_p4, %p649_p7 }
  0x31   : > { %p652_p5 = pnand %p651_p9, %p645_p6 }
  0x33   : > { %655 = shalt.err (!%p652_p5)
}
  0x34   : > { %s698_s6 = smov 128   ;;  %s699_s7 = smov 8  }
  0x35   : > { %560 = dma.hbm_to_vmem [thread:$0]  (!%p783_p13), %s794_s9, 2048, %s796_s11, %s798_s12, %s698_s6, %s698_s6, %s699_s7  }
  0x36   : > { %p888_p8 = scmp.ne.s32.totalorder %s886_s24, 0 }
  0x37   : > { %s168_s8 = sand.u32 (!%p888_p8), 1, %s686_s13   ;;  %p889_p10 = scmp.ne.s32.totalorder (!%p888_p8), %s885_s23, 0 }
  0x38   : > { %166 = sbr.rel (%p888_p8) target bundleno = 405 (0x195), region = 32  ;;  %s539_s10 = sshll.u32 (!%p888_p8), %s168_s8, 7 }
  0x39   : > { %s169_s18 = scalar_lea.sflag (!%p888_p8), [#allocation3], %s168_s8  ;;  %s822_s19 = scalar_lea.vmem (!%p888_p8), [#allocation2], %s539_s10 }
  0x3d   : > { %673 = dma.done.wait (%p889_p10), %s169_s18, 2048  }
  0x3e   : > { %675 = vsyncadd (%p889_p10), %s169_s18, 4294965248  ;;  %p890_p5 = scmp.ne.s32.totalorder %s884_s22, 0 }
  0x40   : > { %677 = dma.done.wait (%p890_p5), [#allocation5], 128  }
  0x41   : > { %679 = vsyncadd (%p890_p5), [#allocation5], 4294967168  ;;  %v206_v0 = vld [vmem:[%s822_s19] sm:$0xff]  ;;  %v208_v2 = vld [vmem:[%s822_s19 + $0x10] sm:$0xff]  ;;  %v700_v33 = vmov 0   ;;  %s541_s24 = sshll.u32 %s530_s16, 1 }
  0x42   : > { %v222_v1 = vld [vmem:[#allocation4] sm:$0xff]  ;;  %v207_v5 = vld [vmem:[%s822_s19 + $0x8] sm:$0xff]  ;;  %v209_v10 = vld [vmem:[%s822_s19 + $0x18] sm:$0xff]  ;;  %601 = vset.pattern.permute.xlu0 %v700_v33  ;;  %600 = vset.pattern.permute.xlu1 %v700_v33  ;;  %p201_p13 = scmp.lt.s32.totalorder %s541_s24, 3  ;;  %vm427_vm0 = vcmask 1041409   ;;  %vm429_vm1 = vcmask 1042434  }
  0x43   : > { %v223_v3 = vmul.f32 %v222_v1, %v206_v0  ;;  %v225_v4 = vmul.f32 %v222_v1, %v208_v2  ;;  %v214_v6 = vld [vmem:[%s822_s19 + $0x40] sm:$0xff]  ;;  %v224_v7 = vmul.f32 %v222_v1, %v207_v5  ;;  %v215_v9 = vld [vmem:[%s822_s19 + $0x48] sm:$0xff]  ;;  %v226_v12 = vmul.f32 %v222_v1, %v209_v10  ;;  %v216_v13 = vld [vmem:[%s822_s19 + $0x50] sm:$0xff] }
  0x44   : > { %v231_v8 = vmul.f32 %v222_v1, %v214_v6  ;;  %v232_v11 = vmul.f32 %v222_v1, %v215_v9  ;;  %v210_v14 = vld [vmem:[%s822_s19 + $0x20] sm:$0xff]  ;;  %v233_v15 = vmul.f32 %v222_v1, %v216_v13  ;;  %v217_v17 = vld [vmem:[%s822_s19 + $0x58] sm:$0xff]  ;;  %v211_v18 = vld [vmem:[%s822_s19 + $0x28] sm:$0xff]  ;;  %v361_v9 = vlaneseq  ;;  %s896_s24 = smov (!%p201_p13, %s541_s24), 3 }
  0x45   : > { %239 = vadd.xlane.f32.xlu0 %v223_v3  ;;  %243 = vadd.xlane.f32.xlu1 %v225_v4  ;;  %v227_v16 = vmul.f32 %v222_v1, %v210_v14  ;;  %v234_v19 = vmul.f32 %v222_v1, %v217_v17  ;;  %v228_v20 = vmul.f32 %v222_v1, %v211_v18  ;;  %v218_v21 = vld [vmem:[%s822_s19 + $0x60] sm:$0xff]  ;;  %v212_v22 = vld [vmem:[%s822_s19 + $0x30] sm:$0xff]  ;;  %v219_v25 = vld [vmem:[%s822_s19 + $0x68] sm:$0xff]  ;;  %vm431_vm2 = vcmask 1043459   ;;  %s542_s15 = sshll.u32 %s896_s24, 3 }
  0x46   : > { %v235_v23 = vmul.f32 %v222_v1, %v218_v21  ;;  %v229_v24 = vmul.f32 %v222_v1, %v212_v22  ;;  %v213_v26 = vld [vmem:[%s822_s19 + $0x38] sm:$0xff]  ;;  %v236_v27 = vmul.f32 %v222_v1, %v219_v25  ;;  %v220_v29 = vld [vmem:[%s822_s19 + $0x70] sm:$0xff]  ;;  %v543_v34 = vld [vmem:[%s877_s2] ss:$0 sm:$0xff]  ;;  %v364_v13 = vshrl.u32 %v361_v9, 7  ;;  %s204_s9 = scalar_lea.vmem %s878_s3, %s542_s15 }
  0x47   : > { %v230_v28 = vmul.f32 %v222_v1, %v213_v26  ;;  %v221_v30 = vld [vmem:[%s822_s19 + $0x78] sm:$0xff]  ;;  %v237_v31 = vmul.f32 %v222_v1, %v220_v29  ;;  %vm433_vm3 = vcmask 1044484   ;;  %vm435_vm4 = vcmask 1045509  }
  0x48   : > { %v238_v32 = vmul.f32 %v222_v1, %v221_v30  ;;  %vm437_vm5 = vcmask 1046534   ;;  %vm439_vm6 = vcmask 1047559   ;;  %vm450_vm7 = vcmask 64512  }
  0x49   : > { %241 = vadd.xlane.f32.xlu0 %v224_v7  ;;  %255 = vadd.xlane.f32.xlu1 %v231_v8 }
  0x4d   : > { %257 = vadd.xlane.f32.xlu0 %v232_v11  ;;  %245 = vadd.xlane.f32.xlu1 %v226_v12  ;;  %v362_v12 = vand.u32 127, %v361_v9 }
  0x51   : > { %259 = vadd.xlane.f32.xlu0 %v233_v15  ;;  %247 = vadd.xlane.f32.xlu1 %v227_v16  ;;  %v365_v15 = vsub.s32 %v362_v12, %v364_v13 }
  0x55   : > { %261 = vadd.xlane.f32.xlu0 %v234_v19  ;;  %249 = vadd.xlane.f32.xlu1 %v228_v20 }
  0x59   : > { %263 = vadd.xlane.f32.xlu0 %v235_v23  ;;  %251 = vadd.xlane.f32.xlu1 %v229_v24 }
  0x5d   : > { %265 = vadd.xlane.f32.xlu0 %v236_v27  ;;  %253 = vadd.xlane.f32.xlu1 %v230_v28 }
  0x61   : > { %267 = vadd.xlane.f32.xlu0 %v237_v31  ;;  %269 = vadd.xlane.f32.xlu1 %v238_v32 }
  0x77   : > { %278 = vbcast.lane.b32.xlu0 %v543_v34, 256 }
  0xce   : > { %v240_v35 = vpop.xlane.xlu0 %239  ;;  %v244_v41 = vpop.xlane.xlu1 %243 }
  0xd2   : > { %v242_v36 = vpop.xlane.xlu0 %241  ;;  %v256_v44 = vpop.xlane.xlu1 %255 }
  0xd6   : > { %v258_v37 = vpop.xlane.xlu0 %257  ;;  %v246_v48 = vpop.xlane.xlu1 %245 }
  0xda   : > { %v260_v38 = vpop.xlane.xlu0 %259  ;;  %v248_v53 = vpop.xlane.xlu1 %247 }
  0xde   : > { %v262_v39 = vpop.xlane.xlu0 %261  ;;  %v250_v56 = vpop.xlane.xlu1 %249 }
  0xe2   : > { %v264_v40 = vpop.xlane.xlu0 %263  ;;  %v252_v61 = vpop.xlane.xlu1 %251 }
  0xe6   : > { %v266_v42 = vpop.xlane.xlu0 %265  ;;  %v254_v63 = vpop.xlane.xlu1 %253 }
  0xea   : > { %v268_v43 = vpop.xlane.xlu0 %267  ;;  %v270_v2 = vpop.xlane.xlu1 %269 }
  0xee   : > { %v279_v45 = vpop.permute.xlu0 %278 }
  0xef   : > { %v289_v46 = vadd.f32 %v279_v45, %v256_v44  ;;  %v281_v47 = vadd.f32 %v279_v45, %v240_v35  ;;  %v291_v49 = vadd.f32 %v279_v45, %v260_v38  ;;  %v282_v50 = vadd.f32 %v279_v45, %v242_v36 }
  0xf0   : > { %v292_v51 = vadd.f32 %v279_v45, %v262_v39  ;;  %v283_v52 = vadd.f32 %v279_v45, %v244_v41  ;;  %v293_v54 = vadd.f32 %v279_v45, %v264_v40  ;;  %v290_v55 = vadd.f32 %v279_v45, %v258_v37 }
  0xf1   : > { %338 = vperm.xlu0 %601, %v289_v46   ;;  %314 = vperm.xlu1 %600, %v281_v47   ;;  %v294_v57 = vadd.f32 %v279_v45, %v266_v42  ;;  %v284_v58 = vadd.f32 %v279_v45, %v246_v48  ;;  %v295_v59 = vadd.f32 %v279_v45, %v268_v43 }
  0xf2   : > { %v285_v60 = vadd.f32 %v279_v45, %v248_v53  ;;  %v286_v62 = vadd.f32 %v279_v45, %v250_v56  ;;  %v287_v0 = vadd.f32 %v279_v45, %v252_v61  ;;  %v288_v1 = vadd.f32 %v279_v45, %v254_v63 }
  0xf3   : > { %v296_v3 = vadd.f32 %v279_v45, %v270_v2 }
  0xf5   : > { %344 = vperm.xlu0 %601, %v291_v49   ;;  %317 = vperm.xlu1 %600, %v282_v50  }
  0xf9   : > { %347 = vperm.xlu0 %601, %v292_v51   ;;  %320 = vperm.xlu1 %600, %v283_v52  }
  0xfd   : > { %350 = vperm.xlu0 %601, %v293_v54   ;;  %341 = vperm.xlu1 %600, %v290_v55  }
 0x101   : > { %353 = vperm.xlu0 %601, %v294_v57   ;;  %323 = vperm.xlu1 %600, %v284_v58  }
 0x105   : > { %356 = vperm.xlu0 %601, %v295_v59   ;;  %326 = vperm.xlu1 %600, %v285_v60  }
 0x109   : > { %329 = vperm.xlu1 %600, %v286_v62  }
 0x10d   : > { %332 = vperm.xlu1 %600, %v287_v0  }
 0x111   : > { %335 = vperm.xlu1 %600, %v288_v1  }
 0x115   : > { %359 = vperm.xlu1 %600, %v296_v3  }
 0x16c   : > { %v315_v4 = vpop.permute.xlu1 %314  ;;  %v339_v5 = vpop.permute.xlu0 %338 }
 0x16d   : > { %v398_v19 = vrot.slane %v339_v5, %v365_v15  ;;  %v366_v26 = vrot.slane %v315_v4, %v365_v15 }
 0x170   : > { %v318_v6 = vpop.permute.xlu1 %317  ;;  %v345_v7 = vpop.permute.xlu0 %344 }
 0x171   : > { %v370_v21 = vrot.slane %v318_v6, %v365_v15  ;;  %v406_v24 = vrot.slane %v345_v7, %v365_v15 }
 0x173   : > { %v428_v31 = vsel %vm427_vm0, %v370_v21, %v366_v26 }
 0x174   : > { %v321_v8 = vpop.permute.xlu1 %320  ;;  %v348_v11 = vpop.permute.xlu0 %347 }
 0x175   : > { %v374_v25 = vrot.slane %v321_v8, %v365_v15  ;;  %v410_v32 = vrot.slane %v348_v11, %v365_v15 }
 0x177   : > { %v430_v34 = vsel %vm429_vm1, %v374_v25, %v428_v31 }
 0x178   : > { %v342_v10 = vpop.permute.xlu1 %341  ;;  %v351_v16 = vpop.permute.xlu0 %350 }
 0x179   : > { %v402_v18 = vrot.slane %v342_v10, %v365_v15  ;;  %v414_v39 = vrot.slane %v351_v16, %v365_v15 }
 0x17b   : > { %v441_v22 = vsel %vm427_vm0, %v402_v18, %v398_v19 }
 0x17c   : > { %v324_v14 = vpop.permute.xlu1 %323  ;;  %v354_v23 = vpop.permute.xlu0 %353  ;;  %v442_v28 = vsel %vm429_vm1, %v406_v24, %v441_v22 }
 0x17d   : > { %v378_v27 = vrot.slane %v324_v14, %v365_v15  ;;  %v443_v36 = vsel %vm431_vm2, %v410_v32, %v442_v28  ;;  %v418_v42 = vrot.slane %v354_v23, %v365_v15 }
 0x17e   : > { %v444_v45 = vsel %vm433_vm3, %v414_v39, %v443_v36 }
 0x17f   : > { %v432_v37 = vsel %vm431_vm2, %v378_v27, %v430_v34  ;;  %v445_v50 = vsel %vm435_vm4, %v418_v42, %v444_v45 }
 0x180   : > { %v327_v17 = vpop.permute.xlu1 %326  ;;  %v357_v38 = vpop.permute.xlu0 %356 }
 0x181   : > { %v382_v29 = vrot.slane %v327_v17, %v365_v15  ;;  %v422_v46 = vrot.slane %v357_v38, %v365_v15 }
 0x183   : > { %v434_v40 = vsel %vm433_vm3, %v382_v29, %v432_v37  ;;  %v446_v52 = vsel %vm437_vm5, %v422_v46, %v445_v50 }
 0x184   : > { %v330_v20 = vpop.permute.xlu1 %329 }
 0x185   : > { %v386_v33 = vrot.slane %v330_v20, %v365_v15 }
 0x187   : > { %v436_v43 = vsel %vm435_vm4, %v386_v33, %v434_v40 }
 0x188   : > { %v333_v30 = vpop.permute.xlu1 %332 }
 0x189   : > { %v390_v35 = vrot.slane %v333_v30, %v365_v15 }
 0x18b   : > { %v438_v47 = vsel %vm437_vm5, %v390_v35, %v436_v43 }
 0x18c   : > { %v336_v41 = vpop.permute.xlu1 %335 }
 0x18d   : > { %v394_v44 = vrot.slane %v336_v41, %v365_v15 }
 0x18f   : > { %v440_v48 = vsel %vm439_vm6, %v394_v44, %v438_v47 }
 0x190   : > { %451 = vst.msk [vmem:[%s204_s9] sm:$0xff] %vm450_vm7, %v440_v48  ;;  %v360_v49 = vpop.permute.xlu1 %359 }
 0x191   : > { %v426_v51 = vrot.slane %v360_v49, %v365_v15 }
 0x193   : > { %v447_v53 = vsel %vm439_vm6, %v426_v51, %v446_v52 }
 0x194   : > { %452 = vst.msk [vmem:[%s204_s9 + $0x8] sm:$0xff] %vm450_vm7, %v447_v53 }
 0x195 PF: > { %p14_p11 = scmp.ge.s32.totalorder %s741_s17, 4   ;;  %s891_s12 = smov %s686_s13 }
 0x196   : > { %s892_s13 = smov %s690_s14  ;;  %s893_s14 = smov %s751_s20 }
 0x197   : > { %s894_s15 = smov %s741_s17  ;;  %16 = sbr.rel (!%p14_p11) target bundleno = 4 (0x4), region = 76 }
 0x19c   :  { %475 = vsyncpa [#allocation3], 1 }
 0x19d   :  { %477 = vsyncpa [#allocation3 + $0x1], 1 }
 0x19e   :  { %478 = vsyncpa [#allocation5], 1 }

</bundles_post_ra>
